<compile_context>
chip_gen: v6e
topology: v6e:2x2x1
jax: 0.10.0
libtpu: 0.0.40
codegen_flags: <defaults>
</compile_context>

<pallas_src>
import math
import functools

import jax
import jax.numpy as jnp
from jax import lax
from jax.experimental import pallas as pl
from jax.experimental.pallas import tpu as pltpu


def _layernorm(x, w, b, eps=1e-8):
    u = jnp.mean(x, axis=-1, keepdims=True)
    s = jnp.mean((x - u) ** 2, axis=-1, keepdims=True)
    return w * ((x - u) / jnp.sqrt(s + eps)) + b


def _gelu_tanh(x):
    # torch reference formula: 0.5*x*(1+tanh(sqrt(2/pi)*(x+0.044715*x^3)))
    return 0.5 * x * (1.0 + jnp.tanh(math.sqrt(2.0 / math.pi)
                                     * (x + 0.044715 * x ** 3)))


def block_kernel(x_ref, ln1w_ref, ln1b_ref, caw_ref, cab_ref, cpw_ref, cpb_ref,
                 ln2w_ref, ln2b_ref, fcw_ref, fcb_ref, pjw_ref, pjb_ref,
                 out_ref, k_ref, v_ref, *, n_head):
    x = x_ref[0]                               # (T, E)
    T, E = x.shape
    HD = E // n_head

    # ---- ln_1 + c_attn : single (T,E)x(E,3E) MXU matmul ----
    h = _layernorm(x, ln1w_ref[...], ln1b_ref[...])
    qkv = jnp.dot(h, caw_ref[...], preferred_element_type=jnp.float32) + cab_ref[...]

    # fold 1/sqrt(HD) into q (touches T*E elements, not NH*T*T)
    q = qkv[:, 0:E] * (1.0 / math.sqrt(HD))
    k = qkv[:, E:2 * E]
    v = qkv[:, 2 * E:3 * E]

    # lane-dense `present` stores: full (T, E) slabs, no per-head masked vst.
    # (head split / transpose / stack happens in the wrapper.)
    k_ref[0] = k.astype(k_ref.dtype)
    v_ref[0] = v.astype(v_ref.dtype)

    # ---- batched multi-head attention (all heads in one dot_general) ----
    q3 = q.reshape(T, n_head, HD)
    k3 = k.reshape(T, n_head, HD)
    v3 = v.reshape(T, n_head, HD)

    scores = jnp.einsum('qhd,khd->hqk', q3, k3,
                        preferred_element_type=jnp.float32)      # (NH, T, T)

    rows = lax.broadcasted_iota(jnp.int32, (T, T), 0)
    cols = lax.broadcasted_iota(jnp.int32, (T, T), 1)
    scores = jnp.where(cols <= rows, scores, -1e10)               # causal mask

    scores = scores - jnp.max(scores, axis=-1, keepdims=True)
    p = jnp.exp(scores)
    denom = jnp.sum(p, axis=-1, keepdims=True)
    p = p * pl.reciprocal(denom, approx=True)                     # EUP divide

    a = jnp.einsum('hqk,khd->qhd', p, v3,
                   preferred_element_type=jnp.float32).reshape(T, E)
    a = jnp.dot(a, cpw_ref[...], preferred_element_type=jnp.float32) + cpb_ref[...]
    # dropout(p) in eval mode -> identity

    # ---- first residual ----
    x1 = x + a

    # ---- ln_2 + MLP ----
    h2 = _layernorm(x1, ln2w_ref[...], ln2b_ref[...])
    ff = jax.nn.gelu(jnp.dot(h2, fcw_ref[...],
                             preferred_element_type=jnp.float32) + fcb_ref[...],
                     approximate=True)           # tanh GELU == torch formula
    m = jnp.dot(ff, pjw_ref[...], preferred_element_type=jnp.float32) + pjb_ref[...]

    out_ref[0] = (x1 + m).astype(out_ref.dtype)


def gpt_block(x, params, n_head):
    B, T, E = x.shape
    NS = 4 * E
    HD = E // n_head

    def rep(shape):
        nd = len(shape)
        return pl.BlockSpec(shape, lambda b, _nd=nd: (0,) * _nd)

    in_specs = [
        pl.BlockSpec((1, T, E), lambda b: (b, 0, 0)),   # x
        rep((1, E)), rep((1, E)),                        # ln_1 w, b
        rep((E, 3 * E)), rep((1, 3 * E)),                # c_attn w, b
        rep((E, E)), rep((1, E)),                        # c_proj w, b
        rep((1, E)), rep((1, E)),                        # ln_2 w, b
        rep((E, NS)), rep((1, NS)),                      # c_fc w, b
        rep((NS, E)), rep((1, E)),                       # mlp c_proj w, b
    ]
    out_specs = [
        pl.BlockSpec((1, T, E), lambda b: (b, 0, 0)),    # block output
        pl.BlockSpec((1, T, E), lambda b: (b, 0, 0)),    # k slab (lane dense)
        pl.BlockSpec((1, T, E), lambda b: (b, 0, 0)),    # v slab (lane dense)
    ]
    out_shape = [
        jax.ShapeDtypeStruct((B, T, E), x.dtype),
        jax.ShapeDtypeStruct((B, T, E), x.dtype),
        jax.ShapeDtypeStruct((B, T, E), x.dtype),
    ]

    # advisory cost estimate for the XLA scheduler
    flops = 2 * B * T * E * (3 * E + E + 4 * E + 4 * E) \
        + 4 * B * n_head * T * T * HD
    transcendentals = B * (n_head * T * T + T * 4 * E)
    weight_bytes = 4 * (E * 3 * E + 3 * E + E * E + E
                        + E * NS + NS + NS * E + E + 4 * E)
    act_bytes = 4 * 4 * B * T * E            # x in + 3 outputs
    cost = pl.CostEstimate(flops=flops, transcendentals=transcendentals,
                           bytes_accessed=weight_bytes + act_bytes)

    out, kf, vf = pl.pallas_call(
        functools.partial(block_kernel, n_head=n_head),
        out_shape=out_shape,
        grid_spec=pltpu.PrefetchScalarGridSpec(
            num_scalar_prefetch=0, grid=(B,),
            in_specs=in_specs, out_specs=out_specs),
        compiler_params=pltpu.CompilerParams(
            dimension_semantics=("parallel",),
            vmem_limit_bytes=48 * 1024 * 1024),
        cost_estimate=cost,
    )(x, *params)

    # present = stack(key.transpose(-2,-1), value) -> (2, B, NH, T, HD)
    pk = kf.reshape(B, T, n_head, HD).transpose(0, 2, 1, 3)
    pv = vf.reshape(B, T, n_head, HD).transpose(0, 2, 1, 3)
    present = jnp.stack([pk, pv], axis=0)
    return out, present


def ref_block(x, params, n_head):
    """Pure-JAX reference mirroring the PyTorch forward."""
    (ln1w, ln1b, caw, cab, cpw, cpb, ln2w, ln2b, fcw, fcb, pjw, pjb) = params
    B, T, E = x.shape
    HD = E // n_head

    def ln(x, w, b):
        u = x.mean(-1, keepdims=True)
        s = ((x - u) ** 2).mean(-1, keepdims=True)
        return w[0] * ((x - u) / jnp.sqrt(s + 1e-8)) + b[0]

    h = ln(x, ln1w, ln1b)
    qkv = h @ caw + cab[0]
    q, k, v = jnp.split(qkv, 3, axis=-1)
    sh = lambda t: t.reshape(B, T, n_head, HD).transpose(0, 2, 1, 3)
    q, k, v = sh(q), sh(k), sh(v)
    w = jnp.einsum('bhtd,bhsd->bhts', q, k) / math.sqrt(HD)
    mask = jnp.tril(jnp.ones((T, T), jnp.float32))
    w = w * mask - 1e10 * (1 - mask)
    w = jax.nn.softmax(w, axis=-1)
    a = jnp.einsum('bhts,bhsd->bhtd', w, v)
    a = a.transpose(0, 2, 1, 3).reshape(B, T, E)
    a = a @ cpw + cpb[0]
    x1 = x + a
    h2 = ln(x1, ln2w, ln2b)
    ff = _gelu_tanh(h2 @ fcw + fcb[0])
    m = ff @ pjw + pjb[0]
    present = jnp.stack([k, v], axis=0)
    return x1 + m, present


if __name__ == "__main__":
    B, T, E, NH = 2, 8, 32, 4        # n_ctx=8, n_embd=32, n_head=4
    NS = 4 * E
    key = jax.random.PRNGKey(0)
    keys = jax.random.split(key, 10)

    def lin_w(k, fi, fo):
        return jax.random.uniform(k, (fi, fo), jnp.float32, -1.0, 1.0) / math.sqrt(fi)

    def lin_b(k, fi, fo):
        return jax.random.uniform(k, (1, fo), jnp.float32, -1.0, 1.0) / math.sqrt(fi)

    params = (
        jnp.ones((1, E), jnp.float32),  jnp.zeros((1, E), jnp.float32),   # ln_1
        lin_w(keys[0], E, 3 * E),       lin_b(keys[1], E, 3 * E),         # c_attn
        lin_w(keys[2], E, E),           lin_b(keys[3], E, E),             # c_proj
        jnp.ones((1, E), jnp.float32),  jnp.zeros((1, E), jnp.float32),   # ln_2
        lin_w(keys[4], E, NS),          lin_b(keys[5], E, NS),            # mlp c_fc
        lin_w(keys[6], NS, E),          lin_b(keys[7], NS, E),            # mlp c_proj
    )
    x = jax.random.normal(keys[8], (B, T, E), jnp.float32)

    out, present = gpt_block(x, params, NH)
    jax.block_until_ready((out, present))

    ref_out, ref_present = ref_block(x, params, NH)
    # out tolerance is looser because of the approximate (EUP) softmax
    # reciprocal; present is exact c_attn output and stays tight.
    assert jnp.allclose(out, ref_out, atol=1e-2, rtol=1e-2)
    assert jnp.allclose(present, ref_present, atol=1e-4, rtol=1e-4)

    print("KERNEL_OK")
</pallas_src>

<mosaic_0001>
module attributes {stable_mosaic.version = 11 : i64} {
  func.func @block_kernel(%arg0: i32, %arg1: memref<1x8x32xf32, #tpu.memory_space<vmem>>, %arg2: memref<1x32xf32, #tpu.memory_space<vmem>>, %arg3: memref<1x32xf32, #tpu.memory_space<vmem>>, %arg4: memref<32x96xf32, #tpu.memory_space<vmem>>, %arg5: memref<1x96xf32, #tpu.memory_space<vmem>>, %arg6: memref<32x32xf32, #tpu.memory_space<vmem>>, %arg7: memref<1x32xf32, #tpu.memory_space<vmem>>, %arg8: memref<1x32xf32, #tpu.memory_space<vmem>>, %arg9: memref<1x32xf32, #tpu.memory_space<vmem>>, %arg10: memref<32x128xf32, #tpu.memory_space<vmem>>, %arg11: memref<1x128xf32, #tpu.memory_space<vmem>>, %arg12: memref<128x32xf32, #tpu.memory_space<vmem>>, %arg13: memref<1x32xf32, #tpu.memory_space<vmem>>, %arg14: memref<1x8x32xf32, #tpu.memory_space<vmem>>, %arg15: memref<1x8x32xf32, #tpu.memory_space<vmem>>, %arg16: memref<1x8x32xf32, #tpu.memory_space<vmem>>) attributes {dimension_semantics = [#tpu.dimension_semantics<parallel>], iteration_bounds = array<i64: 2>, scalar_prefetch = 0 : i64, scratch_operands = 0 : i64, tpu.core_type = #tpu.core_type<tc>, window_params = [{transform_indices = @transform_0, window_bounds = array<i64: 1, 8, 32>}, {pipeline_mode = #tpu.pipeline_mode<synchronous>, transform_indices = @transform_1, window_bounds = array<i64: 1, 32>}, {pipeline_mode = #tpu.pipeline_mode<synchronous>, transform_indices = @transform_2, window_bounds = array<i64: 1, 32>}, {pipeline_mode = #tpu.pipeline_mode<synchronous>, transform_indices = @transform_3, window_bounds = array<i64: 32, 96>}, {pipeline_mode = #tpu.pipeline_mode<synchronous>, transform_indices = @transform_4, window_bounds = array<i64: 1, 96>}, {pipeline_mode = #tpu.pipeline_mode<synchronous>, transform_indices = @transform_5, window_bounds = array<i64: 32, 32>}, {pipeline_mode = #tpu.pipeline_mode<synchronous>, transform_indices = @transform_6, window_bounds = array<i64: 1, 32>}, {pipeline_mode = #tpu.pipeline_mode<synchronous>, transform_indices = @transform_7, window_bounds = array<i64: 1, 32>}, {pipeline_mode = #tpu.pipeline_mode<synchronous>, transform_indices = @transform_8, window_bounds = array<i64: 1, 32>}, {pipeline_mode = #tpu.pipeline_mode<synchronous>, transform_indices = @transform_9, window_bounds = array<i64: 32, 128>}, {pipeline_mode = #tpu.pipeline_mode<synchronous>, transform_indices = @transform_10, window_bounds = array<i64: 1, 128>}, {pipeline_mode = #tpu.pipeline_mode<synchronous>, transform_indices = @transform_11, window_bounds = array<i64: 128, 32>}, {pipeline_mode = #tpu.pipeline_mode<synchronous>, transform_indices = @transform_12, window_bounds = array<i64: 1, 32>}, {transform_indices = @transform_13, window_bounds = array<i64: 1, 8, 32>}, {transform_indices = @transform_14, window_bounds = array<i64: 1, 8, 32>}, {transform_indices = @transform_15, window_bounds = array<i64: 1, 8, 32>}]} {
    %c0 = arith.constant 0 : index
    %c0_0 = arith.constant 0 : index
    %c0_1 = arith.constant 0 : index
    %0 = vector.load %arg1[%c0, %c0_0, %c0_1] : memref<1x8x32xf32, #tpu.memory_space<vmem>>, vector<1x8x32xf32>
    %1 = vector.shape_cast %0 : vector<1x8x32xf32> to vector<8x32xf32>
    %c0_2 = arith.constant 0 : index
    %c0_3 = arith.constant 0 : index
    %2 = vector.load %arg2[%c0_2, %c0_3] : memref<1x32xf32, #tpu.memory_space<vmem>>, vector<1x32xf32>
    %c0_4 = arith.constant 0 : index
    %c0_5 = arith.constant 0 : index
    %3 = vector.load %arg3[%c0_4, %c0_5] : memref<1x32xf32, #tpu.memory_space<vmem>>, vector<1x32xf32>
    %cst = arith.constant dense<0.000000e+00> : vector<8xf32>
    %4 = vector.multi_reduction <add>, %1, %cst [1] : vector<8x32xf32> to vector<8xf32>
    %5 = vector.shape_cast %4 : vector<8xf32> to vector<8x1xf32>
    %cst_6 = arith.constant 3.200000e+01 : f32
    %6 = vector.broadcast %cst_6 : f32 to vector<8x1xf32>
    %7 = arith.divf %5, %6 : vector<8x1xf32>
    %8 = vector.broadcast %7 : vector<8x1xf32> to vector<8x32xf32>
    %9 = arith.subf %1, %8 : vector<8x32xf32>
    %10 = arith.mulf %9, %9 : vector<8x32xf32>
    %cst_7 = arith.constant dense<0.000000e+00> : vector<8xf32>
    %11 = vector.multi_reduction <add>, %10, %cst_7 [1] : vector<8x32xf32> to vector<8xf32>
    %12 = vector.shape_cast %11 : vector<8xf32> to vector<8x1xf32>
    %cst_8 = arith.constant 3.200000e+01 : f32
    %13 = vector.broadcast %cst_8 : f32 to vector<8x1xf32>
    %14 = arith.divf %12, %13 : vector<8x1xf32>
    %15 = vector.broadcast %7 : vector<8x1xf32> to vector<8x32xf32>
    %16 = arith.subf %1, %15 : vector<8x32xf32>
    %cst_9 = arith.constant 9.99999993E-9 : f32
    %17 = vector.broadcast %cst_9 : f32 to vector<8x1xf32>
    %18 = arith.addf %14, %17 : vector<8x1xf32>
    %19 = math.sqrt %18 : vector<8x1xf32>
    %20 = vector.broadcast %19 : vector<8x1xf32> to vector<8x32xf32>
    %21 = arith.divf %16, %20 : vector<8x32xf32>
    %22 = vector.broadcast %2 : vector<1x32xf32> to vector<8x32xf32>
    %23 = arith.mulf %22, %21 : vector<8x32xf32>
    %24 = vector.broadcast %3 : vector<1x32xf32> to vector<8x32xf32>
    %25 = arith.addf %23, %24 : vector<8x32xf32>
    %c0_10 = arith.constant 0 : index
    %c0_11 = arith.constant 0 : index
    %26 = vector.load %arg4[%c0_10, %c0_11] : memref<32x96xf32, #tpu.memory_space<vmem>>, vector<32x96xf32>
    %cst_12 = arith.constant dense<0.000000e+00> : vector<8x96xf32>
    %27 = tpu.matmul %25, %26, %cst_12 {dimension_numbers = #tpu.dot_dimension_numbers<[1], [0], [0], [1], [0, 0, 1, 1], [], []>} : vector<8x32xf32>, vector<32x96xf32>, vector<8x96xf32> -> vector<8x96xf32>
    %c0_13 = arith.constant 0 : index
    %c0_14 = arith.constant 0 : index
    %28 = vector.load %arg5[%c0_13, %c0_14] : memref<1x96xf32, #tpu.memory_space<vmem>>, vector<1x96xf32>
    %29 = vector.broadcast %28 : vector<1x96xf32> to vector<8x96xf32>
    %30 = arith.addf %27, %29 : vector<8x96xf32>
    %31 = vector.extract_strided_slice %30 {offsets = [0, 0], sizes = [8, 32], strides = [1, 1]} : vector<8x96xf32> to vector<8x32xf32>
    %cst_15 = arith.constant 0.353553385 : f32
    %32 = vector.broadcast %cst_15 : f32 to vector<8x32xf32>
    %33 = arith.mulf %31, %32 : vector<8x32xf32>
    %34 = vector.extract_strided_slice %30 {offsets = [0, 32], sizes = [8, 32], strides = [1, 1]} : vector<8x96xf32> to vector<8x32xf32>
    %35 = vector.extract_strided_slice %30 {offsets = [0, 64], sizes = [8, 32], strides = [1, 1]} : vector<8x96xf32> to vector<8x32xf32>
    %c0_16 = arith.constant 0 : index
    %c0_17 = arith.constant 0 : index
    %c0_18 = arith.constant 0 : index
    %36 = vector.load %arg15[%c0_16, %c0_17, %c0_18] : memref<1x8x32xf32, #tpu.memory_space<vmem>>, vector<1x8x32xf32>
    %37 = vector.shape_cast %36 : vector<1x8x32xf32> to vector<8x32xf32>
    %38 = vector.shape_cast %34 : vector<8x32xf32> to vector<1x8x32xf32>
    tpu.vector_store %arg15[%c0_16, %c0_17, %c0_18], %38 {strides = array<i32>} : memref<1x8x32xf32, #tpu.memory_space<vmem>>, vector<1x8x32xf32>,
    %c0_19 = arith.constant 0 : index
    %c0_20 = arith.constant 0 : index
    %c0_21 = arith.constant 0 : index
    %39 = vector.load %arg16[%c0_19, %c0_20, %c0_21] : memref<1x8x32xf32, #tpu.memory_space<vmem>>, vector<1x8x32xf32>
    %40 = vector.shape_cast %39 : vector<1x8x32xf32> to vector<8x32xf32>
    %41 = vector.shape_cast %35 : vector<8x32xf32> to vector<1x8x32xf32>
    tpu.vector_store %arg16[%c0_19, %c0_20, %c0_21], %41 {strides = array<i32>} : memref<1x8x32xf32, #tpu.memory_space<vmem>>, vector<1x8x32xf32>,
    %42 = vector.shape_cast %33 : vector<8x32xf32> to vector<8x4x8xf32>
    %43 = vector.shape_cast %34 : vector<8x32xf32> to vector<8x4x8xf32>
    %44 = vector.shape_cast %35 : vector<8x32xf32> to vector<8x4x8xf32>
    "tpu.trace_start"() <{level = 10 : i32, message = "qhd,khd->hqk"}> : () -> ()
    %cst_22 = arith.constant dense<0.000000e+00> : vector<4x8x8xf32>
    %45 = tpu.matmul %42, %43, %cst_22 {dimension_numbers = #tpu.dot_dimension_numbers<[2], [2], [0], [0], [0, 1, 0, 0, 1, 0], [1], [1]>} : vector<8x4x8xf32>, vector<8x4x8xf32>, vector<4x8x8xf32> -> vector<4x8x8xf32>
    "tpu.trace_stop"() : () -> ()
    %46 = tpu.iota {dimensions = array<i32: 0>} : vector<8x8xi32>
    %47 = tpu.iota {dimensions = array<i32: 1>} : vector<8x8xi32>
    %48 = arith.cmpi sle, %47, %46 : vector<8x8xi32>
    %cst_23 = arith.constant -1.000000e+10 : f32
    %49 = vector.shape_cast %48 : vector<8x8xi1> to vector<1x8x8xi1>
    %50 = vector.broadcast %49 : vector<1x8x8xi1> to vector<4x8x8xi1>
    %51 = vector.broadcast %cst_23 : f32 to vector<4x8x8xf32>
    %52 = arith.select %50, %45, %51 : vector<4x8x8xi1>, vector<4x8x8xf32>
    %cst_24 = arith.constant dense<0xFF800000> : vector<4x8xf32>
    %53 = vector.multi_reduction <maximumf>, %52, %cst_24 [2] : vector<4x8x8xf32> to vector<4x8xf32>
    %54 = vector.shape_cast %53 : vector<4x8xf32> to vector<4x8x1xf32>
    %55 = vector.broadcast %54 : vector<4x8x1xf32> to vector<4x8x8xf32>
    %56 = arith.subf %52, %55 : vector<4x8x8xf32>
    %57 = math.exp %56 : vector<4x8x8xf32>
    %cst_25 = arith.constant dense<0.000000e+00> : vector<4x8xf32>
    %58 = vector.multi_reduction <add>, %57, %cst_25 [2] : vector<4x8x8xf32> to vector<4x8xf32>
    %59 = vector.shape_cast %58 : vector<4x8xf32> to vector<4x8x1xf32>
    %60 = tpu.reciprocal %59 {approx = true} : vector<4x8x1xf32> -> vector<4x8x1xf32>
    %61 = vector.broadcast %60 : vector<4x8x1xf32> to vector<4x8x8xf32>
    %62 = arith.mulf %57, %61 : vector<4x8x8xf32>
    "tpu.trace_start"() <{level = 10 : i32, message = "hqk,khd->qhd"}> : () -> ()
    %cst_26 = arith.constant dense<0.000000e+00> : vector<4x8x8xf32>
    %63 = tpu.matmul %44, %62, %cst_26 {dimension_numbers = #tpu.dot_dimension_numbers<[0], [2], [2], [1], [0, 1, 0, 2, 1, 1], [1], [0]>} : vector<8x4x8xf32>, vector<4x8x8xf32>, vector<4x8x8xf32> -> vector<4x8x8xf32>
    %64 = tpu.transpose %63, [2, 0, 1] : vector<4x8x8xf32> -> vector<8x4x8xf32>
    "tpu.trace_stop"() : () -> ()
    %65 = vector.shape_cast %64 : vector<8x4x8xf32> to vector<8x32xf32>
    %c0_27 = arith.constant 0 : index
    %c0_28 = arith.constant 0 : index
    %66 = vector.load %arg6[%c0_27, %c0_28] : memref<32x32xf32, #tpu.memory_space<vmem>>, vector<32x32xf32>
    %cst_29 = arith.constant dense<0.000000e+00> : vector<8x32xf32>
    %67 = tpu.matmul %65, %66, %cst_29 {dimension_numbers = #tpu.dot_dimension_numbers<[1], [0], [0], [1], [0, 0, 1, 1], [], []>} : vector<8x32xf32>, vector<32x32xf32>, vector<8x32xf32> -> vector<8x32xf32>
    %c0_30 = arith.constant 0 : index
    %c0_31 = arith.constant 0 : index
    %68 = vector.load %arg7[%c0_30, %c0_31] : memref<1x32xf32, #tpu.memory_space<vmem>>, vector<1x32xf32>
    %69 = vector.broadcast %68 : vector<1x32xf32> to vector<8x32xf32>
    %70 = arith.addf %67, %69 : vector<8x32xf32>
    %71 = arith.addf %1, %70 : vector<8x32xf32>
    %c0_32 = arith.constant 0 : index
    %c0_33 = arith.constant 0 : index
    %72 = vector.load %arg8[%c0_32, %c0_33] : memref<1x32xf32, #tpu.memory_space<vmem>>, vector<1x32xf32>
    %c0_34 = arith.constant 0 : index
    %c0_35 = arith.constant 0 : index
    %73 = vector.load %arg9[%c0_34, %c0_35] : memref<1x32xf32, #tpu.memory_space<vmem>>, vector<1x32xf32>
    %cst_36 = arith.constant dense<0.000000e+00> : vector<8xf32>
    %74 = vector.multi_reduction <add>, %71, %cst_36 [1] : vector<8x32xf32> to vector<8xf32>
    %75 = vector.shape_cast %74 : vector<8xf32> to vector<8x1xf32>
    %cst_37 = arith.constant 3.200000e+01 : f32
    %76 = vector.broadcast %cst_37 : f32 to vector<8x1xf32>
    %77 = arith.divf %75, %76 : vector<8x1xf32>
    %78 = vector.broadcast %77 : vector<8x1xf32> to vector<8x32xf32>
    %79 = arith.subf %71, %78 : vector<8x32xf32>
    %80 = arith.mulf %79, %79 : vector<8x32xf32>
    %cst_38 = arith.constant dense<0.000000e+00> : vector<8xf32>
    %81 = vector.multi_reduction <add>, %80, %cst_38 [1] : vector<8x32xf32> to vector<8xf32>
    %82 = vector.shape_cast %81 : vector<8xf32> to vector<8x1xf32>
    %cst_39 = arith.constant 3.200000e+01 : f32
    %83 = vector.broadcast %cst_39 : f32 to vector<8x1xf32>
    %84 = arith.divf %82, %83 : vector<8x1xf32>
    %85 = vector.broadcast %77 : vector<8x1xf32> to vector<8x32xf32>
    %86 = arith.subf %71, %85 : vector<8x32xf32>
    %cst_40 = arith.constant 9.99999993E-9 : f32
    %87 = vector.broadcast %cst_40 : f32 to vector<8x1xf32>
    %88 = arith.addf %84, %87 : vector<8x1xf32>
    %89 = math.sqrt %88 : vector<8x1xf32>
    %90 = vector.broadcast %89 : vector<8x1xf32> to vector<8x32xf32>
    %91 = arith.divf %86, %90 : vector<8x32xf32>
    %92 = vector.broadcast %72 : vector<1x32xf32> to vector<8x32xf32>
    %93 = arith.mulf %92, %91 : vector<8x32xf32>
    %94 = vector.broadcast %73 : vector<1x32xf32> to vector<8x32xf32>
    %95 = arith.addf %93, %94 : vector<8x32xf32>
    %c0_41 = arith.constant 0 : index
    %c0_42 = arith.constant 0 : index
    %96 = vector.load %arg10[%c0_41, %c0_42] : memref<32x128xf32, #tpu.memory_space<vmem>>, vector<32x128xf32>
    %cst_43 = arith.constant dense<0.000000e+00> : vector<8x128xf32>
    %97 = tpu.matmul %95, %96, %cst_43 {dimension_numbers = #tpu.dot_dimension_numbers<[1], [0], [0], [1], [0, 0, 1, 1], [], []>} : vector<8x32xf32>, vector<32x128xf32>, vector<8x128xf32> -> vector<8x128xf32>
    %c0_44 = arith.constant 0 : index
    %c0_45 = arith.constant 0 : index
    %98 = vector.load %arg11[%c0_44, %c0_45] : memref<1x128xf32, #tpu.memory_space<vmem>>, vector<1x128xf32>
    %99 = vector.broadcast %98 : vector<1x128xf32> to vector<8x128xf32>
    %100 = arith.addf %97, %99 : vector<8x128xf32>
    %101 = arith.mulf %100, %100 : vector<8x128xf32>
    %102 = arith.mulf %100, %101 : vector<8x128xf32>
    %cst_46 = arith.constant 4.471500e-02 : f32
    %103 = vector.broadcast %cst_46 : f32 to vector<8x128xf32>
    %104 = arith.mulf %103, %102 : vector<8x128xf32>
    %105 = arith.addf %100, %104 : vector<8x128xf32>
    %cst_47 = arith.constant 0.797884583 : f32
    %106 = vector.broadcast %cst_47 : f32 to vector<8x128xf32>
    %107 = arith.mulf %106, %105 : vector<8x128xf32>
    %108 = math.tanh %107 : vector<8x128xf32>
    %cst_48 = arith.constant 1.000000e+00 : f32
    %109 = vector.broadcast %cst_48 : f32 to vector<8x128xf32>
    %110 = arith.addf %109, %108 : vector<8x128xf32>
    %cst_49 = arith.constant 5.000000e-01 : f32
    %111 = vector.broadcast %cst_49 : f32 to vector<8x128xf32>
    %112 = arith.mulf %111, %110 : vector<8x128xf32>
    %113 = arith.mulf %100, %112 : vector<8x128xf32>
    %c0_50 = arith.constant 0 : index
    %c0_51 = arith.constant 0 : index
    %114 = vector.load %arg12[%c0_50, %c0_51] : memref<128x32xf32, #tpu.memory_space<vmem>>, vector<128x32xf32>
    %cst_52 = arith.constant dense<0.000000e+00> : vector<8x32xf32>
    %115 = tpu.matmul %113, %114, %cst_52 {dimension_numbers = #tpu.dot_dimension_numbers<[1], [0], [0], [1], [0, 0, 1, 1], [], []>} : vector<8x128xf32>, vector<128x32xf32>, vector<8x32xf32> -> vector<8x32xf32>
    %c0_53 = arith.constant 0 : index
    %c0_54 = arith.constant 0 : index
    %116 = vector.load %arg13[%c0_53, %c0_54] : memref<1x32xf32, #tpu.memory_space<vmem>>, vector<1x32xf32>
    %117 = vector.broadcast %116 : vector<1x32xf32> to vector<8x32xf32>
    %118 = arith.addf %115, %117 : vector<8x32xf32>
    %119 = arith.addf %71, %118 : vector<8x32xf32>
    %c0_55 = arith.constant 0 : index
    %c0_56 = arith.constant 0 : index
    %c0_57 = arith.constant 0 : index
    %120 = vector.load %arg14[%c0_55, %c0_56, %c0_57] : memref<1x8x32xf32, #tpu.memory_space<vmem>>, vector<1x8x32xf32>
    %121 = vector.shape_cast %120 : vector<1x8x32xf32> to vector<8x32xf32>
    %122 = vector.shape_cast %119 : vector<8x32xf32> to vector<1x8x32xf32>
    tpu.vector_store %arg14[%c0_55, %c0_56, %c0_57], %122 {strides = array<i32>} : memref<1x8x32xf32, #tpu.memory_space<vmem>>, vector<1x8x32xf32>,
    return
  }
  func.func @transform_0(%arg0: i32) -> (i32, i32, i32) {
    %c0_i32 = arith.constant 0 : i32
    %c0_i32_0 = arith.constant 0 : i32
    %c0_i32_1 = arith.constant 0 : i32
    return %arg0, %c0_i32, %c0_i32_0 : i32, i32, i32
  }
  func.func @transform_1(%arg0: i32) -> (i32, i32) {
    %c0_i32 = arith.constant 0 : i32
    %c0_i32_0 = arith.constant 0 : i32
    %c0_i32_1 = arith.constant 0 : i32
    return %c0_i32, %c0_i32_0 : i32, i32
  }
  func.func @transform_2(%arg0: i32) -> (i32, i32) {
    %c0_i32 = arith.constant 0 : i32
    %c0_i32_0 = arith.constant 0 : i32
    %c0_i32_1 = arith.constant 0 : i32
    return %c0_i32, %c0_i32_0 : i32, i32
  }
  func.func @transform_3(%arg0: i32) -> (i32, i32) {
    %c0_i32 = arith.constant 0 : i32
    %c0_i32_0 = arith.constant 0 : i32
    %c0_i32_1 = arith.constant 0 : i32
    return %c0_i32, %c0_i32_0 : i32, i32
  }
  func.func @transform_4(%arg0: i32) -> (i32, i32) {
    %c0_i32 = arith.constant 0 : i32
    %c0_i32_0 = arith.constant 0 : i32
    %c0_i32_1 = arith.constant 0 : i32
    return %c0_i32, %c0_i32_0 : i32, i32
  }
  func.func @transform_5(%arg0: i32) -> (i32, i32) {
    %c0_i32 = arith.constant 0 : i32
    %c0_i32_0 = arith.constant 0 : i32
    %c0_i32_1 = arith.constant 0 : i32
    return %c0_i32, %c0_i32_0 : i32, i32
  }
  func.func @transform_6(%arg0: i32) -> (i32, i32) {
    %c0_i32 = arith.constant 0 : i32
    %c0_i32_0 = arith.constant 0 : i32
    %c0_i32_1 = arith.constant 0 : i32
    return %c0_i32, %c0_i32_0 : i32, i32
  }
  func.func @transform_7(%arg0: i32) -> (i32, i32) {
    %c0_i32 = arith.constant 0 : i32
    %c0_i32_0 = arith.constant 0 : i32
    %c0_i32_1 = arith.constant 0 : i32
    return %c0_i32, %c0_i32_0 : i32, i32
  }
  func.func @transform_8(%arg0: i32) -> (i32, i32) {
    %c0_i32 = arith.constant 0 : i32
    %c0_i32_0 = arith.constant 0 : i32
    %c0_i32_1 = arith.constant 0 : i32
    return %c0_i32, %c0_i32_0 : i32, i32
  }
  func.func @transform_9(%arg0: i32) -> (i32, i32) {
    %c0_i32 = arith.constant 0 : i32
    %c0_i32_0 = arith.constant 0 : i32
    %c0_i32_1 = arith.constant 0 : i32
    return %c0_i32, %c0_i32_0 : i32, i32
  }
  func.func @transform_10(%arg0: i32) -> (i32, i32) {
    %c0_i32 = arith.constant 0 : i32
    %c0_i32_0 = arith.constant 0 : i32
    %c0_i32_1 = arith.constant 0 : i32
    return %c0_i32, %c0_i32_0 : i32, i32
  }
  func.func @transform_11(%arg0: i32) -> (i32, i32) {
    %c0_i32 = arith.constant 0 : i32
    %c0_i32_0 = arith.constant 0 : i32
    %c0_i32_1 = arith.constant 0 : i32
    return %c0_i32, %c0_i32_0 : i32, i32
  }
  func.func @transform_12(%arg0: i32) -> (i32, i32) {
    %c0_i32 = arith.constant 0 : i32
    %c0_i32_0 = arith.constant 0 : i32
    %c0_i32_1 = arith.constant 0 : i32
    return %c0_i32, %c0_i32_0 : i32, i32
  }
  func.func @transform_13(%arg0: i32) -> (i32, i32, i32) {
    %c0_i32 = arith.constant 0 : i32
    %c0_i32_0 = arith.constant 0 : i32
    %c0_i32_1 = arith.constant 0 : i32
    return %arg0, %c0_i32, %c0_i32_0 : i32, i32, i32
  }
  func.func @transform_14(%arg0: i32) -> (i32, i32, i32) {
    %c0_i32 = arith.constant 0 : i32
    %c0_i32_0 = arith.constant 0 : i32
    %c0_i32_1 = arith.constant 0 : i32
    return %arg0, %c0_i32, %c0_i32_0 : i32, i32, i32
  }
  func.func @transform_15(%arg0: i32) -> (i32, i32, i32) {
    %c0_i32 = arith.constant 0 : i32
    %c0_i32_0 = arith.constant 0 : i32
    %c0_i32_1 = arith.constant 0 : i32
    return %arg0, %c0_i32, %c0_i32_0 : i32, i32, i32
  }
}

</mosaic_0001>

<bundles_post_ra>
// kernel: tpu_custom_call.1
= control target key start
LH: loop header
LB: loop body
LE: loop exit
PB: predicated region body
PF: predicated region fallthrough
CT: control target
= control target key end

     0   :  { %s3231_s0 = inlined_call_operand.vmem [shape: f32[2,8,32], index: 0, kind: input, shape index: {}]   ;;  %s3232_s1 = inlined_call_operand.vmem [shape: f32[1,32], index: 1, kind: input, shape index: {}]   ;;  %s3233_s2 = inlined_call_operand.vmem [shape: f32[1,32], index: 2, kind: input, shape index: {}]   ;;  %s3234_s3 = inlined_call_operand.vmem [shape: f32[32,96], index: 3, kind: input, shape index: {}]   ;;  %s3235_s4 = inlined_call_operand.vmem [shape: f32[1,96], index: 4, kind: input, shape index: {}]   ;;  %s3236_s5 = inlined_call_operand.vmem [shape: f32[32,32], index: 5, kind: input, shape index: {}]   ;;  %s3237_s6 = inlined_call_operand.vmem [shape: f32[1,32], index: 6, kind: input, shape index: {}]   ;;  %s3238_s7 = inlined_call_operand.vmem [shape: f32[1,32], index: 7, kind: input, shape index: {}]   ;;  %s3239_s8 = inlined_call_operand.vmem [shape: f32[1,32], index: 8, kind: input, shape index: {}]   ;;  %s3240_s9 = inlined_call_operand.vmem [shape: f32[32,128], index: 9, kind: input, shape index: {}]   ;;  %s3241_s10 = inlined_call_operand.vmem [shape: f32[1,128], index: 10, kind: input, shape index: {}]   ;;  %s3242_s11 = inlined_call_operand.vmem [shape: f32[128,32], index: 11, kind: input, shape index: {}]   ;;  %s3243_s12 = inlined_call_operand.vmem [shape: f32[1,32], index: 12, kind: input, shape index: {}]   ;;  %s3244_s13 = inlined_call_operand.hbm [shape: f32[2,8,32], index: 13, kind: output, shape index: {0}]   ;;  %s3245_s14 = inlined_call_operand.hbm [shape: f32[2,8,32], index: 14, kind: output, shape index: {1}]   ;;  %s3246_s15 = inlined_call_operand.hbm [shape: f32[2,8,32], index: 15, kind: output, shape index: {2}]  }
   0x1   :  { %3251 = sst [smem:[#allocation9_spill]] %s3231_s0 }
   0x2   :  { %3252 = sst [smem:[#allocation10_spill]] %s3232_s1 }
   0x3   :  { %3253 = sst [smem:[#allocation11_spill]] %s3233_s2 }
   0x4   :  { %3254 = sst [smem:[#allocation12_spill]] %s3234_s3 }
   0x5   :  { %3255 = sst [smem:[#allocation13_spill]] %s3235_s4 }
   0x6   :  { %3256 = sst [smem:[#allocation14_spill]] %s3236_s5 }
   0x7   :  { %3257 = sst [smem:[#allocation15_spill]] %s3237_s6 }
   0x8   :  { %3258 = sst [smem:[#allocation16_spill]] %s3238_s7 }
   0x9   :  { %21 = vsyncpa [#allocation3], 0 }
   0xa   :  { %23 = vsyncpa [#allocation3 + $0x1], 0 }
   0xb   :  { %24 = vsyncpa [#allocation5], 0 }
   0xc   :  { %26 = vsyncpa [#allocation5 + $0x1], 0  ;;  %s2833_s18 = smov 0   ;;  %s2835_s19 = smov 0  }
   0xd   :  { %s2837_s20 = smov 0   ;;  %s2839_s21 = smov 0  }
   0xe LB: > { %s2854_s22 = sadd.s32 4294967295, %s2736_s21   ;;  %s3247_s23 = sadd.s32 4294967294, %s2736_s21   ;;  %s2736_s21 = sphi %s2839_s21, %s3276_s21   ;;  %s2732_s20 = sphi %s2837_s20, %s3275_s20   ;;  %s2728_s19 = sphi %s2835_s19, %s3274_s19   ;;  %s2724_s18 = sphi %s2833_s18, %s3273_s18  }
   0xf   : > { %s2858_s24 = sadd.s32 1, %s2736_s21   ;;  %s317_s25 = sadd.s32 1, %s2732_s20 }
  0x10   : > { %s314_s26 = ssub.s32 %s2736_s21, %s2858_s24  ;;  %p327_p0 = scmp.ne.s32.totalorder %s2732_s20, %s2728_s19 }
  0x11   : > { %p315_p1 = scmp.eq.s32.totalorder %s314_s26, 0  ;;  %p328_p2 = scmp.eq.s32.totalorder %s2854_s22, 1 }
  0x12   : > { %p333_p3 = scmp.ne.s32.totalorder %s2728_s19, %s2724_s18  ;;  %p334_p4 = scmp.eq.s32.totalorder %s3247_s23, 1 }
  0x13   : > { %s2871_s27 = scalar_select %p315_p1, %s2732_s20, %s317_s25  }
  0x14   : > { %p2873_p5 = por %p328_p2, %p327_p0  ;;  %p2877_p6 = por %p334_p4, %p333_p3 }
  0x15   : > { %p2339_p7 = scmp.ge.s32.totalorder %s2736_s21, 1  ;;  %p447_p8 = scmp.lt.s32.totalorder %s2736_s21, 3 }
  0x17   : > { %p448_p9 = pnand %p2339_p7, %p447_p8 }
  0x18   : > { %p504_p10 = scmp.lt.s32.totalorder (!%p448_p9), %s2854_s22, 1  ;;  %s3261_s0 = sld [smem:[#allocation9_spill]] (!%p448_p9) }
  0x19   : > { %451 = sbr.rel (%p448_p9) target bundleno = 2864 (0xb30), region = 72  ;;  %s3262_s3 = sld [smem:[#allocation12_spill]] (!%p448_p9) }
  0x1a   : > { %s3263_s1 = sld [smem:[#allocation10_spill]] (!%p448_p9)  ;;  %s2741_s17 = smov (!%p448_p9), 120  }
  0x1b   : > { %s3264_s2 = sld [smem:[#allocation11_spill]] (!%p448_p9)  ;;  %s2742_s25 = smov (!%p448_p9), 112  }
  0x1c   : > { %s3265_s4 = sld [smem:[#allocation13_spill]] (!%p448_p9)  ;;  %s3248_s23 = sand.u32 (!%p448_p9), 1, %s2728_s19  }
  0x1d   : > { %s3266_s5 = sld [smem:[#allocation14_spill]] (!%p448_p9) }
  0x1e   : > { %s505_s30 = scalar_select %p504_p10, %s2854_s22, 1  ;;  %vm511_vm0 = vcmask 261120   ;;  %v2738_v8 = vmov 0.0   ;;  %vm2739_vm1 = vmmov 0   ;;  %vm791_vm4 = vcmask 64512  }
  0x1f   : > { %v550_v7 = vld [vmem:[%s3262_s3 + $0x18] sm:$0xff]  ;;  %2425 = vmatprep.subr.mxu0 %v2738_v8  ;;  %v549_v9 = vld [vmem:[%s3262_s3 + $0x10] sm:$0xff]  ;;  %2433 = vmatprep.mubr.msk.f32.mxu0 %vm2739_vm1, %v2738_v8  ;;  %v548_v10 = vld [vmem:[%s3262_s3 + $0x8] sm:$0xff]  ;;  %v1080_v45 = vlaneseq  ;;  %vm1853_vm6 = vcmask 130048   ;;  %vm1855_vm7 = vcmask 195584   ;;  %s3267_s6 = sld [smem:[#allocation15_spill]] }
  0x20   : > { %s2343_s16 = sshll.u32 %s505_s30, 3  ;;  %2426 = vmatpush3.msra.mxu0 %v550_v7  ;;  %2446 = vmatprep.subr.mxu1 %v2738_v8  ;;  %v547_v11 = vld [vmem:[%s3262_s3] sm:$0xff]  ;;  %s2941_s30 = sshll.u32 %s3248_s23, 3 }
  0x21   : > { %s507_s26 = scalar_lea.vmem %s3261_s0, %s2343_s16  ;;  %2427 = vmatprep.subr.mxu0 %v2738_v8  ;;  %2448 = vmatprep.mubr.msk.f32.mxu1 %vm2739_vm1, %v2738_v8  ;;  %v2344_v21 = vld [vmem:[%s3263_s1] ss:$0 sm:$0xff]  ;;  %s2740_s16 = smov 104   ;;  %v2966_v46 = vshrl.u32 %v1080_v45, 7  ;;  %v1083_v47 = vand.u32 127, %v1080_v45 }
  0x22   : > { %v2888_v0 = vld [vmem:[%s507_s26] sm:$0xff]  ;;  %2428 = vmatpush3.msra.mxu0 %v549_v9  ;;  %s2743_s26 = smov 96   ;;  %s3249_s0 = scalar_lea.vmem [#allocation4], %s2941_s30 }
  0x23   : > { %v512_v1 = vsel %vm511_vm0, %v2888_v0, 0.0  ;;  %2429 = vmatprep.subr.mxu0 %v2738_v8  ;;  %v2345_v23 = vld [vmem:[%s3264_s2] ss:$0 sm:$0xff]  ;;  %vm1084_vm5 = vcmp.le.s32.totalorder %v1083_v47, %v2966_v46  ;;  %s2747_s23 = smov 16   ;;  %s3268_s7 = sld [smem:[#allocation16_spill]] }
  0x24   : > { %513 = vadd.xlane.f32.xlu0 %v512_v1  ;;  %2430 = vmatpush3.msra.mxu0 %v548_v10  ;;  %v2346_v26 = vld [vmem:[%s3265_s4] ss:$0 sm:$0xff]  ;;  %s3136_s1 = sshll.u32 %s2854_s22, 7 }
  0x25   : > { %2431 = vmatprep.subr.mxu0 %v2738_v8 }
  0x26   : > { %2432 = vmatpush3.msra.mxu0 %v547_v11 }
  0x27   : > { %2436 = vmatprep.subr.mxu0 %v2738_v8 }
  0xad   : > { %v514_v2 = vpop.xlane.xlu0 %513 }
  0xae   : > { %v516_v3 = vmul.f32 0.03125, %v514_v2 }
  0xb0   : > { %v517_v4 = vsub.f32 %v2888_v0, %v516_v3 }
  0xb2   : > { %v518_v5 = vmul.f32 %v517_v4, %v517_v4 }
  0xb4   : > { %v519_v6 = vsel %vm511_vm0, %v518_v5, 0.0 }
  0xb5   : > { %520 = vadd.xlane.f32.xlu0 %v519_v6 }
 0x13e   : > { %v521_v12 = vpop.xlane.xlu0 %520 }
 0x13f   : > { %v522_v13 = vmul.f32 0.03125, %v521_v12 }
 0x141   : > { %v523_v14 = vadd.f32 1e-08, %v522_v13 }
 0x143   : > { %2594 = vrsqrt.f32 %v523_v14  ;;  %vm526_vm2 = vcmp.eq.f32.partialorder %v523_v14, inf  ;;  %v529_v17 = vand.u32 2147483648, %v523_v14  ;;  %vm528_vm3 = vcmp.eq.f32.partialorder %v523_v14, 0.0 }
 0x150   : > { %v2595_v15 = vpop.eup %2594 }
 0x151   : > { %v525_v16 = vmul.f32 %v2595_v15, %v523_v14 }
 0x153   : > { %v527_v18 = vsel %vm526_vm2, %v523_v14, %v525_v16 }
 0x154   : > { %v530_v19 = vsel %vm528_vm3, %v529_v17, %v527_v18 }
 0x155   : > { %2596 = vrcp.f32 %v530_v19 }
 0x162   : > { %v2597_v20 = vpop.eup %2596 }
 0x163   : > { %v532_v22 = vmul.f32 %v2597_v20, %v517_v4 }
 0x165   : > { %v539_v24 = vmul.f32 %v2344_v21, %v532_v22 }
 0x167   : > { %v546_v25 = vadd.f32 %v2345_v23, %v539_v24 }
 0x169   : > { %2434 = vmatmul.mubr.msk.f32.vlgmr.msra.gmra.mxu0 %vm511_vm0, %v546_v25 }
 0x16a   : > { %2438 = vmatprep.mubr.msk.f32.mxu0 %vm2739_vm1, %v2738_v8 }
 0x229   : > { %v627_v27 = vpop.f32.mrf.mxu0 }
 0x22a   : > { %v2928_v28 = vadd.f32 %v2346_v26, %v627_v27 }
 0x22b   : > { %v2435_v29 = vpop.f32.mrf.mxu0 }
 0x22c   : > { %652 = vrot.lane.b32.xlu0 %v2928_v28, %s2740_s16  ;;  %648 = vrot.lane.b32.xlu1 %v2928_v28, %s2741_s17  ;;  %v631_v30 = vmul.f32 0.35355338, %v2928_v28 }
 0x230   : > { %650 = vrot.lane.b32.xlu1 %v2928_v28, %s2742_s25  ;;  %646 = vrot.lane.b32.xlu0 %v631_v30, %s2740_s16  ;;  %s2744_s16 = smov 64  }
 0x234   : > { %633 = vrot.lane.b32.xlu1 %v2928_v28, %s2743_s26 }
 0x29e   : > { %v2935_v31 = vpop.permute.xlu1 %648  ;;  %v2943_v33 = vpop.permute.xlu0 %652 }
 0x29f   : > { %654 = vrot.lane.b32.xlu1 %v2935_v31, %s2743_s26 }
 0x2a2   : > { %v651_v32 = vpop.permute.xlu1 %650  ;;  %v647_v41 = vpop.permute.xlu0 %646 }
 0x2a3   : > { %656 = vrot.lane.b32.xlu1 %v651_v32, %s2743_s26 }
 0x2a6   : > { %v634_v34 = vpop.permute.xlu1 %633 }
 0x2a7   : > { %636 = vst.msk [vmem:[%s3249_s0] sm:$0xff] %vm511_vm0, %v634_v34  ;;  %658 = vrot.lane.b32.xlu1 %v2943_v33, %s2743_s26  ;;  %s2748_s26 = smov 8   ;;  %s2171_s0 = sand.u32 1, %s2854_s22  }
 0x2a8   : > { %s3148_s4 = scalar_lea.sflag [#allocation5], %s2171_s0  ;;  %s2750_s22 = smov [#allocation4]  }
 0x2ab   : > { %642 = vrot.lane.b32.xlu1 %v631_v30, %s2741_s17  ;;  %s3250_s17 = scalar_lea.vmem [#allocation6], %s2941_s30 }
 0x2af   : > { %644 = vrot.lane.b32.xlu1 %v631_v30, %s2742_s25  ;;  %s3269_s25 = scalar_lea.vmem [#allocation6], %s2941_s30 }
 0x2d8   : > { %663 = vxpose.xlu1.b32.start.end [1/1] (short) (narrow) %v634_v34, 8 }
 0x311   : > { %v655_v35 = vpop.permute.xlu1 %654 }
 0x312   : > { %695 = vxpose.xlu0.b32.start.end [1/1] (short) (narrow) %v655_v35, 8 }
 0x315   : > { %v657_v36 = vpop.permute.xlu1 %656 }
 0x316   : > { %727 = vxpose.xlu0.b32.start.end [1/1] (short) (narrow) %v657_v36, 8 }
 0x319   : > { %v659_v37 = vpop.permute.xlu1 %658 }
 0x31a   : > { %759 = vxpose.xlu0.b32.start.end [1/1] (short) (narrow) %v659_v37, 8 }
 0x31d   : > { %v643_v38 = vpop.permute.xlu1 %642 }
 0x321   : > { %v645_v39 = vpop.permute.xlu1 %644 }
 0x354   : > { %v679_v40 = vpop.trf.xlu1 }
 0x355   : > { %2437 = vmatpush3.msra.mxu0 %v679_v40 }
 0x356   : > { %2439 = vmatmul.mubr.msk.f32.vlgmr.msra.gmra.mxu0 %vm791_vm4, %v631_v30  ;;  %2441 = vmatprep.subr.mxu0 %v2738_v8 }
 0x357   : > { %2443 = vmatprep.mubr.msk.f32.mxu0 %vm2739_vm1, %v2738_v8 }
 0x38e   : > { %v711_v42 = vpop.trf.xlu0 }
 0x38f   : > { %2442 = vmatpush3.msra.mxu0 %v711_v42 }
 0x390   : > { %2444 = vmatmul.mubr.msk.f32.vlgmr.msra.gmra.mxu0 %vm791_vm4, %v643_v38  ;;  %2451 = vmatprep.subr.mxu0 %v2738_v8 }
 0x391   : > { %2453 = vmatprep.mubr.msk.f32.mxu0 %vm2739_vm1, %v2738_v8 }
 0x392   : > { %v743_v43 = vpop.trf.xlu0 }
 0x393   : > { %2447 = vmatpush3.msra.mxu1 %v743_v43 }
 0x394   : > { %2449 = vmatmul.mubr.msk.f32.vlgmr.msra.gmra.mxu1 %vm791_vm4, %v645_v39  ;;  %2456 = vmatprep.subr.mxu1 %v2738_v8 }
 0x395   : > { %2458 = vmatprep.mubr.msk.f32.mxu1 %vm2739_vm1, %v2738_v8 }
 0x396   : > { %v775_v44 = vpop.trf.xlu0 }
 0x397   : > { %2452 = vmatpush3.msra.mxu0 %v775_v44 }
 0x398   : > { %2454 = vmatmul.mubr.msk.f32.vlgmr.msra.gmra.mxu0 %vm791_vm4, %v647_v41  ;;  %2461 = vmatprep.subr.mxu0 %v2738_v8 }
 0x399   : > { %2463 = vmatprep.mubr.msk.f32.mxu0 %vm2739_vm1, %v2738_v8 }
 0x416   : > { %v860_v48 = vpop.f32.mrf.mxu0 }
 0x417   : > { %v1087_v49 = vsel %vm1084_vm5, %v860_v48, -1e+10 }
 0x418   : > { %v2440_v50 = vpop.f32.mrf.mxu0  ;;  %v1091_v51 = vsel %vm791_vm4, %v1087_v49, -inf }
 0x419   : > { %1092 = vmax.xlane.f32.xlu0 %v1091_v51  ;;  %v1860_v51 = vld [vmem:[%s3266_s5 + $0x18] sm:$0xff] }
 0x42f   : > { %637 = vrot.lane.b32.xlu0 %v2928_v28, %s2744_s16 }
 0x433   : > { %1137 = vrot.lane.b32.xlu0 %v651_v32, %s2744_s16 }
 0x450   : > { %v932_v52 = vpop.f32.mrf.mxu0 }
 0x451   : > { %v1088_v53 = vsel %vm1084_vm5, %v932_v52, -1e+10  ;;  %v2745_v52 = vmov 1983009808  }
 0x452   : > { %v2445_v54 = vpop.f32.mrf.mxu0  ;;  %v1094_v55 = vsel %vm791_vm4, %v1088_v53, -inf }
 0x453   : > { %1095 = vmax.xlane.f32.xlu1 %v1094_v55  ;;  %v2746_v55 = vmov 1934713408  }
 0x454   : > { %v1004_v56 = vpop.f32.mrf.mxu1 }
 0x455   : > { %v1089_v57 = vsel %vm1084_vm5, %v1004_v56, -1e+10  ;;  %v1739_v56 = vunpack.c.l.s4 %v2746_v55 }
 0x456   : > { %v2450_v58 = vpop.f32.mrf.mxu1  ;;  %v1097_v59 = vsel %vm791_vm4, %v1089_v57, -inf }
 0x457   : > { %1098 = vmax.xlane.f32.xlu1 %v1097_v59 }
 0x458   : > { %v1076_v60 = vpop.f32.mrf.mxu0 }
 0x459   : > { %v1090_v61 = vsel %vm1084_vm5, %v1076_v60, -1e+10  ;;  %v1740_v60 = vunpack.c.0.s8 %v1739_v56 }
 0x45a   : > { %v2455_v62 = vpop.f32.mrf.mxu0  ;;  %v1100_v63 = vsel %vm791_vm4, %v1090_v61, -inf }
 0x45b   : > { %1101 = vmax.xlane.f32.xlu1 %v1100_v63 }
 0x46c   : > { %1135 = vrot.lane.b32.xlu1 %v2935_v31, %s2744_s16 }
 0x470   : > { %1139 = vrot.lane.b32.xlu1 %v2943_v33, %s2744_s16  ;;  %s2749_s16 = smov 24  }
 0x4a2   : > { %v1093_v1 = vpop.xlane.xlu0 %1092 }
 0x4a3   : > { %v1103_v2 = vsub.f32 %v1087_v49, %v1093_v1 }
 0x4a5   : > { %v1107_v3 = vmul.f32 1.442695, %v1103_v2 }
 0x4a6   : > { %v638_v4 = vpop.permute.xlu0 %637 }
 0x4a7   : > { %2598 = vpow2.f32 %v1107_v3  ;;  %640 = vst.msk [vmem:[%s3250_s17] sm:$0xff] %vm511_vm0, %v638_v4 }
 0x4aa   : > { %v1138_v24 = vpop.permute.xlu0 %1137 }
 0x4b4   : > { %v2599_v5 = vpop.eup %2598 }
 0x4b5   : > { %v1115_v6 = vsel %vm791_vm4, %v2599_v5, 0.0 }
 0x4b6   : > { %1116 = vadd.xlane.f32.xlu1 %v1115_v6 }
 0x4dc   : > { %v1096_v7 = vpop.xlane.xlu1 %1095 }
 0x4dd   : > { %v1104_v9 = vsub.f32 %v1088_v53, %v1096_v7  ;;  %v1707_v53 = vunpack.c.l.s4 %v2745_v52 }
 0x4df   : > { %v1109_v10 = vmul.f32 1.442695, %v1104_v9  ;;  %v1708_v58 = vunpack.c.0.s8 %v1707_v53 }
 0x4e0   : > { %v1099_v11 = vpop.xlane.xlu1 %1098 }
 0x4e1   : > { %2600 = vpow2.f32 %v1109_v10  ;;  %v1105_v12 = vsub.f32 %v1089_v57, %v1099_v11 }
 0x4e3   : > { %v1111_v13 = vmul.f32 1.442695, %v1105_v12 }
 0x4e4   : > { %v1102_v14 = vpop.xlane.xlu1 %1101 }
 0x4e5   : > { %2602 = vpow2.f32 %v1111_v13  ;;  %v1106_v15 = vsub.f32 %v1090_v61, %v1102_v14  ;;  %v1711_v61 = vsub.s32 %v1708_v58, %v2966_v46  ;;  %v1859_v14 = vld [vmem:[%s3266_s5 + $0x10] sm:$0xff]  ;;  %v1981_v58 = vld [vmem:[%s3240_s9 + $0x18] sm:$0xff] }
 0x4e7   : > { %v1113_v16 = vmul.f32 1.442695, %v1106_v15  ;;  %v1858_v15 = vld [vmem:[%s3266_s5 + $0x8] sm:$0xff] }
 0x4e8   : > { %v1136_v23 = vpop.permute.xlu1 %1135 }
 0x4e9   : > { %2604 = vpow2.f32 %v1113_v16 }
 0x4ec   : > { %v1140_v25 = vpop.permute.xlu1 %1139 }
 0x4ee   : > { %v2601_v17 = vpop.eup %2600 }
 0x4ef   : > { %v1118_v18 = vsel %vm791_vm4, %v2601_v17, 0.0 }
 0x4f0   : > { %1119 = vadd.xlane.f32.xlu0 %v1118_v18 }
 0x4f2   : > { %v2603_v19 = vpop.eup %2602 }
 0x4f3   : > { %v1121_v20 = vsel %vm791_vm4, %v2603_v19, 0.0 }
 0x4f4   : > { %1122 = vadd.xlane.f32.xlu1 %v1121_v20 }
 0x4f6   : > { %v2605_v21 = vpop.eup %2604 }
 0x4f7   : > { %v1124_v22 = vsel %vm791_vm4, %v2605_v21, 0.0 }
 0x4f8   : > { %1125 = vadd.xlane.f32.xlu0 %v1124_v22 }
 0x525   : > { %1144 = vxpose.xlu0.b32.start.end [1/1] (short) (narrow) %v638_v4, 8  ;;  %v1743_v4 = vsub.s32 %v1740_v60, %v2966_v46  ;;  %v1978_v60 = vld [vmem:[%s3240_s9] sm:$0xff] }
 0x527   : > { %1176 = vxpose.xlu1.b32.start.end [1/1] (short) (narrow) %v1136_v23, 8  ;;  %v1857_v23 = vld [vmem:[%s3266_s5] sm:$0xff] }
 0x529   : > { %1208 = vxpose.xlu0.b32.start.end [1/1] (short) (narrow) %v1138_v24, 8 }
 0x52d   : > { %1240 = vxpose.xlu0.b32.start.end [1/1] (short) (narrow) %v1140_v25, 8 }
 0x53f   : > { %v1117_v26 = vpop.xlane.xlu1 %1116 }
 0x540   : > { %2606 = vrcp.f32 %v1117_v26 }
 0x54d   : > { %v2607_v27 = vpop.eup %2606 }
 0x54e   : > { %v1131_v28 = vmul.f32 %v2607_v27, %v2599_v5 }
 0x550   : > { %2457 = vmatpush3.xpose.msk.msra.mxu1 %vm791_vm4, %v1131_v28 }
 0x551   : > { %2466 = vmatprep.subr.mxu1 %v2738_v8 }
 0x579   : > { %v1120_v29 = vpop.xlane.xlu0 %1119 }
 0x57a   : > { %2608 = vrcp.f32 %v1120_v29 }
 0x57d   : > { %v1123_v32 = vpop.xlane.xlu1 %1122 }
 0x57e   : > { %2610 = vrcp.f32 %v1123_v32 }
 0x581   : > { %v1126_v33 = vpop.xlane.xlu0 %1125 }
 0x582   : > { %2612 = vrcp.f32 %v1126_v33 }
 0x587   : > { %v2609_v30 = vpop.eup %2608 }
 0x588   : > { %v1132_v31 = vmul.f32 %v2609_v30, %v2601_v17 }
 0x58a   : > { %2462 = vmatpush3.xpose.msk.msra.mxu0 %vm791_vm4, %v1132_v31 }
 0x58b   : > { %2471 = vmatprep.subr.mxu0 %v2738_v8  ;;  %v2611_v34 = vpop.eup %2610 }
 0x58c   : > { %v1133_v37 = vmul.f32 %v2611_v34, %v2603_v19 }
 0x58f   : > { %v2613_v35 = vpop.eup %2612 }
 0x590   : > { %v1134_v39 = vmul.f32 %v2613_v35, %v2605_v21 }
 0x5a1   : > { %v1160_v36 = vpop.trf.xlu0 }
 0x5a2   : > { %2459 = vmatmul.mubr.msk.f32.vlgmr.msra.gmra.mxu1 %vm791_vm4, %v1160_v36 }
 0x5a3   : > { %2467 = vmatpush3.xpose.msk.msra.mxu1 %vm791_vm4, %v1133_v37  ;;  %v1192_v38 = vpop.trf.xlu1  ;;  %2468 = vmatprep.mubr.msk.f32.mxu1 %vm2739_vm1, %v2738_v8 }
 0x5a4   : > { %2464 = vmatmul.mubr.msk.f32.vlgmr.msra.gmra.mxu0 %vm791_vm4, %v1192_v38  ;;  %2498 = vmatprep.subr.mxu1 %v2738_v8 }
 0x5a5   : > { %2472 = vmatpush3.xpose.msk.msra.mxu0 %vm791_vm4, %v1134_v39  ;;  %v1224_v40 = vpop.trf.xlu0  ;;  %2473 = vmatprep.mubr.msk.f32.mxu0 %vm2739_vm1, %v2738_v8 }
 0x5a6   : > { %2469 = vmatmul.mubr.msk.f32.vlgmr.msra.gmra.mxu1 %vm791_vm4, %v1224_v40  ;;  %2476 = vmatprep.subr.mxu0 %v2738_v8 }
 0x5a7   : > { %2530 = vmatprep.mubr.msk.f32.mxu1 %vm2739_vm1, %v2738_v8 }
 0x5a9   : > { %v1256_v41 = vpop.trf.xlu0 }
 0x5aa   : > { %2474 = vmatmul.mubr.msk.f32.vlgmr.msra.gmra.mxu0 %vm791_vm4, %v1256_v41 }
 0x5ab   : > { %2484 = vmatprep.mubr.msk.f32.mxu0 %vm2739_vm1, %v2738_v8  ;;  %2477 = vmatpush3.msra.mxu0 %v1860_v51 }
 0x5ac   : > { %2478 = vmatprep.subr.mxu0 %v2738_v8 }
 0x5ad   : > { %2479 = vmatpush3.msra.mxu0 %v1859_v14  ;;  %v2085_v14 = vld [vmem:[%s3242_s11 + $0x70] sm:$0xff] }
 0x5ae   : > { %2480 = vmatprep.subr.mxu0 %v2738_v8 }
 0x5af   : > { %2481 = vmatpush3.msra.mxu0 %v1858_v15  ;;  %v2084_v15 = vld [vmem:[%s3242_s11 + $0x68] sm:$0xff] }
 0x5b0   : > { %2482 = vmatprep.subr.mxu0 %v2738_v8 }
 0x5b1   : > { %2483 = vmatpush3.msra.mxu0 %v1857_v23  ;;  %v2075_v23 = vld [vmem:[%s3242_s11 + $0x20] sm:$0xff] }
 0x5b2   : > { %2487 = vmatprep.subr.mxu0 %v2738_v8 }
 0x662   : > { %v1344_v42 = vpop.f32.mrf.mxu1 }
 0x663   : > { %1576 = vxpose.xlu0.b32.start.end [1/1] (short) (narrow) %v1344_v42, 8 }
 0x664   : > { %v2460_v43 = vpop.f32.mrf.mxu1  ;;  %v1420_v44 = vpop.f32.mrf.mxu0 }
 0x665   : > { %1608 = vxpose.xlu1.b32.start.end [1/1] (short) (narrow) %v1420_v44, 8 }
 0x666   : > { %v1496_v45 = vpop.f32.mrf.mxu1  ;;  %v2465_v47 = vpop.f32.mrf.mxu0 }
 0x667   : > { %1640 = vxpose.xlu0.b32.start.end [1/1] (short) (narrow) %v1496_v45, 8  ;;  %v2362_v47 = vld [vmem:[%s3267_s6] ss:$0 sm:$0xff] }
 0x668   : > { %v2470_v48 = vpop.f32.mrf.mxu1 }
 0x66a   : > { %v1572_v49 = vpop.f32.mrf.mxu0 }
 0x66b   : > { %1672 = vxpose.xlu1.b32.start.end [1/1] (short) (narrow) %v1572_v49, 8 }
 0x66c   : > { %v2475_v50 = vpop.f32.mrf.mxu0 }
 0x6df   : > { %v1592_v54 = vpop.trf.xlu0 }
 0x6e1   : > { %v1624_v57 = vpop.trf.xlu1 }
 0x6e3   : > { %v1656_v59 = vpop.trf.xlu0 }
 0x6e4   : > { %v1704_v62 = vcombine.low %v1592_v54, %v1656_v59  ;;  %v1705_v63 = vcombine.high %v1592_v54, %v1656_v59  ;;  %v1979_v59 = vld [vmem:[%s3240_s9 + $0x8] sm:$0xff] }
 0x6e6   : > { %v1712_v5 = vrot.slane %v1704_v62, %v1711_v61  ;;  %v1719_v6 = vrot.slane %v1705_v63, %v1711_v61 }
 0x6e7   : > { %v1688_v1 = vpop.trf.xlu1 }
 0x6e8   : > { %v1720_v2 = vcombine.low %v1624_v57, %v1688_v1  ;;  %v1721_v3 = vcombine.high %v1624_v57, %v1688_v1 }
 0x6ea   : > { %v1728_v7 = vrot.slane %v1720_v2, %v1711_v61  ;;  %v1735_v9 = vrot.slane %v1721_v3, %v1711_v61 }
 0x6ec   : > { %v1736_v10 = vcombine.low %v1712_v5, %v1728_v7  ;;  %v1737_v11 = vcombine.high %v1712_v5, %v1728_v7  ;;  %v1752_v12 = vcombine.low %v1719_v6, %v1735_v9  ;;  %v1753_v13 = vcombine.high %v1719_v6, %v1735_v9  ;;  %v2364_v7 = vld [vmem:[%s3268_s7] ss:$0 sm:$0xff] }
 0x6ee   : > { %v1744_v16 = vrot.slane %v1736_v10, %v1743_v4  ;;  %v1751_v17 = vrot.slane %v1737_v11, %v1743_v4  ;;  %v1760_v18 = vrot.slane %v1752_v12, %v1743_v4  ;;  %v1767_v46 = vrot.slane %v1753_v13, %v1743_v4  ;;  %v2365_v10 = vld [vmem:[%s3239_s8] ss:$0 sm:$0xff]  ;;  %v2086_v13 = vld [vmem:[%s3242_s11 + $0x78] sm:$0xff] }
 0x6ef   : > { %2499 = vmatpush3.msra.mxu1 %v2086_v13 }
 0x6f0   : > { %v1772_v19 = vcombine.low %v1744_v16, %v1751_v17  ;;  %v2360_v20 = vcombine.high %v1744_v16, %v1751_v17  ;;  %v1788_v21 = vcombine.low %v1760_v18, %v1767_v46  ;;  %v2361_v22 = vcombine.high %v1760_v18, %v1767_v46  ;;  %2500 = vmatprep.subr.mxu1 %v2738_v8  ;;  %v2083_v16 = vld [vmem:[%s3242_s11 + $0x60] sm:$0xff]  ;;  %v2082_v17 = vld [vmem:[%s3242_s11 + $0x58] sm:$0xff]  ;;  %v2081_v18 = vld [vmem:[%s3242_s11 + $0x50] sm:$0xff] }
 0x6f1   : > { %2501 = vmatpush3.msra.mxu1 %v2085_v14  ;;  %v2080_v46 = vld [vmem:[%s3242_s11 + $0x48] sm:$0xff] }
 0x6f2   : > { %v1779_v24 = vrot.slane %v1772_v19, %v1711_v61  ;;  %v1787_v25 = vrot.slane %v2360_v20, %v1711_v61  ;;  %v1795_v26 = vrot.slane %v1788_v21, %v1711_v61  ;;  %v1803_v27 = vrot.slane %v2361_v22, %v1711_v61  ;;  %2502 = vmatprep.subr.mxu1 %v2738_v8  ;;  %v2079_v19 = vld [vmem:[%s3242_s11 + $0x40] sm:$0xff]  ;;  %v2078_v20 = vld [vmem:[%s3242_s11 + $0x38] sm:$0xff]  ;;  %v2077_v21 = vld [vmem:[%s3242_s11 + $0x30] sm:$0xff] }
 0x6f3   : > { %2503 = vmatpush3.msra.mxu1 %v2084_v15  ;;  %v2076_v22 = vld [vmem:[%s3242_s11 + $0x28] sm:$0xff] }
 0x6f4   : > { %v1805_v28 = vcombine.high %v1779_v24, %v1787_v25  ;;  %v1821_v29 = vcombine.high %v1795_v26, %v1803_v27  ;;  %v1804_v30 = vcombine.low %v1779_v24, %v1787_v25  ;;  %v1820_v31 = vcombine.low %v1795_v26, %v1803_v27  ;;  %2504 = vmatprep.subr.mxu1 %v2738_v8  ;;  %v2074_v24 = vld [vmem:[%s3242_s11 + $0x18] sm:$0xff]  ;;  %v2073_v25 = vld [vmem:[%s3242_s11 + $0x10] sm:$0xff]  ;;  %v2072_v26 = vld [vmem:[%s3242_s11 + $0x8] sm:$0xff] }
 0x6f5   : > { %2505 = vmatpush3.msra.mxu1 %v2083_v16  ;;  %v2071_v27 = vld [vmem:[%s3242_s11] sm:$0xff] }
 0x6f6   : > { %v1819_v32 = vrot.slane %v1805_v28, %v1743_v4  ;;  %v1835_v33 = vrot.slane %v1821_v29, %v1743_v4  ;;  %v1812_v34 = vrot.slane %v1804_v30, %v1743_v4  ;;  %v1828_v35 = vrot.slane %v1820_v31, %v1743_v4  ;;  %2506 = vmatprep.subr.mxu1 %v2738_v8  ;;  %v2366_v28 = vld [vmem:[%s3241_s10] ss:$0 sm:$0xff] }
 0x6f7   : > { %2507 = vmatpush3.msra.mxu1 %v2082_v17 }
 0x6f8   : > { %v1838_v36 = vcombine.low %v1819_v32, %v1835_v33  ;;  %v1837_v37 = vcombine.high %v1812_v34, %v1828_v35  ;;  %v1836_v38 = vcombine.low %v1812_v34, %v1828_v35  ;;  %v1839_v39 = vcombine.high %v1819_v32, %v1835_v33  ;;  %2508 = vmatprep.subr.mxu1 %v2738_v8 }
 0x6f9   : > { %2509 = vmatpush3.msra.mxu1 %v2081_v18 }
 0x6fa   : > { %1845 = vrot.lane.b32.xlu1 %v1838_v36, %s2747_s23  ;;  %1841 = vrot.lane.b32.xlu0 %v1837_v37, %s2748_s26  ;;  %s2216_s23 = sshll.u32 %s3269_s25, 4  ;;  %s3142_s26 = scalar_lea.hbm %s3245_s14, %s3136_s1  ;;  %s3146_s23 = int_to_ptr.vmem [resolvable:$true] %s2216_s23 }
 0x6fb   : > { %2510 = vmatprep.subr.mxu1 %v2738_v8  ;;  %s2624_s25 = sshll.u32 %s2750_s22, 4  ;;  %s2625_s25 = int_to_ptr.vmem [resolvable:$false] %s2624_s25 }
 0x6fc   : > { %2511 = vmatpush3.msra.mxu1 %v2080_v46  ;;  %s2626_s6 = scalar_lea.vmem %s2625_s25, 256 }
 0x6fd   : > { %2512 = vmatprep.subr.mxu1 %v2738_v8 }
 0x6fe   : > { %1849 = vrot.lane.b32.xlu1 %v1839_v39, %s2749_s16  ;;  %2513 = vmatpush3.msra.mxu1 %v2079_v19  ;;  %s3270_s16 = scalar_lea.vmem [#allocation4], %s2941_s30 }
 0x6ff   : > { %2514 = vmatprep.subr.mxu1 %v2738_v8  ;;  %s2203_s3 = sshll.u32 %s3270_s16, 4  ;;  %s2204_s3 = int_to_ptr.vmem [resolvable:$true] %s2203_s3 }
 0x700   : > { %2515 = vmatpush3.msra.mxu1 %v2078_v20  ;;  %s2620_s5 = scalar_lea.vmem %s2204_s3, 128  ;;  %p2627_p0 = scmp.lt.s32.totalorder %s2204_s3, %s2625_s25 }
 0x701   : > { %2516 = vmatprep.subr.mxu1 %v2738_v8  ;;  %p2621_p11 = scmp.ne.s32.totalorder %s2204_s3, %s2620_s5  ;;  %p2628_p1 = scmp.lt.s32.totalorder %s2626_s6, %s2620_s5 }
 0x702   : > { %2517 = vmatpush3.msra.mxu1 %v2077_v21 }
 0x703   : > { %2518 = vmatprep.subr.mxu1 %v2738_v8  ;;  %p2622_p12 = pnand %p2621_p11, %p2873_p5  ;;  %p2629_p2 = por %p2628_p1, %p2627_p0 }
 0x704   : > { %2519 = vmatpush3.msra.mxu1 %v2076_v22 }
 0x705   : > { %2520 = vmatprep.subr.mxu1 %v2738_v8  ;;  %p2623_p13 = pneg %p2622_p12 }
 0x706   : > { %2521 = vmatpush3.msra.mxu1 %v2075_v23 }
 0x707   : > { %2522 = vmatprep.subr.mxu1 %v2738_v8  ;;  %p2630_p3 = pnand %p2629_p2, %p2623_p13 }
 0x708   : > { %2523 = vmatpush3.msra.mxu1 %v2074_v24 }
 0x709   : > { %2524 = vmatprep.subr.mxu1 %v2738_v8 }
 0x70a   : > { %2525 = vmatpush3.msra.mxu1 %v2073_v25 }
 0x70b   : > { %2526 = vmatprep.subr.mxu1 %v2738_v8 }
 0x70c   : > { %2527 = vmatpush3.msra.mxu1 %v2072_v26 }
 0x70d   : > { %2528 = vmatprep.subr.mxu1 %v2738_v8 }
 0x70e   : > { %2529 = vmatpush3.msra.mxu1 %v2071_v27 }
 0x76c   : > { %v1846_v40 = vpop.permute.xlu1 %1845  ;;  %v1842_v41 = vpop.permute.xlu0 %1841 }
 0x76d   : > { %v1852_v42 = vsel %vm791_vm4, %v1836_v38, %v1842_v41 }
 0x76e   : > { %v1854_v44 = vsel %vm1853_vm6, %v1852_v42, %v1846_v40 }
 0x770   : > { %v1850_v43 = vpop.permute.xlu1 %1849 }
 0x771   : > { %v1856_v45 = vsel %vm1855_vm7, %v1854_v44, %v1850_v43 }
 0x772   : > { %2485 = vmatmul.mubr.msk.f32.vlgmr.msra.gmra.mxu0 %vm511_vm0, %v1856_v45 }
 0x773   : > { %2495 = vmatprep.mubr.msk.f32.mxu0 %vm2739_vm1, %v2738_v8  ;;  %2488 = vmatpush3.msra.mxu0 %v1981_v58 }
 0x774   : > { %2489 = vmatprep.subr.mxu0 %v2738_v8 }
 0x832   : > { %v1937_v48 = vpop.f32.mrf.mxu0 }
 0x833   : > { %v1938_v49 = vadd.f32 %v2362_v47, %v1937_v48 }
 0x834   : > { %v2486_v50 = vpop.f32.mrf.mxu0 }
 0x835   : > { %v3038_v51 = vadd.f32 %v1938_v49, %v2888_v0  ;;  %v1980_v0 = vld [vmem:[%s3240_s9 + $0x10] sm:$0xff] }
 0x836   : > { %2490 = vmatpush3.msra.mxu0 %v1980_v0 }
 0x837   : > { %v1944_v52 = vsel %vm511_vm0, %v3038_v51, 0.0  ;;  %2491 = vmatprep.subr.mxu0 %v2738_v8 }
 0x838   : > { %1945 = vadd.xlane.f32.xlu1 %v1944_v52  ;;  %2492 = vmatpush3.msra.mxu0 %v1979_v59 }
 0x839   : > { %2493 = vmatprep.subr.mxu0 %v2738_v8 }
 0x83a   : > { %2494 = vmatpush3.msra.mxu0 %v1978_v60 }
 0x8c1   : > { %v1946_v53 = vpop.xlane.xlu1 %1945 }
 0x8c2   : > { %v1947_v54 = vmul.f32 0.03125, %v1946_v53 }
 0x8c4   : > { %v1948_v55 = vsub.f32 %v3038_v51, %v1947_v54 }
 0x8c6   : > { %v1949_v56 = vmul.f32 %v1948_v55, %v1948_v55 }
 0x8c8   : > { %v1950_v57 = vsel %vm511_vm0, %v1949_v56, 0.0 }
 0x8c9   : > { %1951 = vadd.xlane.f32.xlu0 %v1950_v57 }
 0x952   : > { %v1952_v61 = vpop.xlane.xlu0 %1951 }
 0x953   : > { %v1953_v62 = vmul.f32 0.03125, %v1952_v61 }
 0x955   : > { %v1954_v63 = vadd.f32 1e-08, %v1953_v62 }
 0x957   : > { %2614 = vrsqrt.f32 %v1954_v63  ;;  %vm1957_vm8 = vcmp.eq.f32.partialorder %v1954_v63, inf  ;;  %v1960_v3 = vand.u32 2147483648, %v1954_v63  ;;  %vm1959_vm9 = vcmp.eq.f32.partialorder %v1954_v63, 0.0 }
 0x964   : > { %v2615_v1 = vpop.eup %2614 }
 0x965   : > { %v1956_v2 = vmul.f32 %v2615_v1, %v1954_v63 }
 0x967   : > { %v1958_v4 = vsel %vm1957_vm8, %v1954_v63, %v1956_v2 }
 0x968   : > { %v1961_v5 = vsel %vm1959_vm9, %v1960_v3, %v1958_v4 }
 0x969   : > { %2616 = vrcp.f32 %v1961_v5 }
 0x976   : > { %v2617_v6 = vpop.eup %2616 }
 0x977   : > { %v1963_v9 = vmul.f32 %v2617_v6, %v1948_v55 }
 0x979   : > { %v1970_v11 = vmul.f32 %v2364_v7, %v1963_v9 }
 0x97b   : > { %v1977_v12 = vadd.f32 %v2365_v10, %v1970_v11 }
 0x97d   : > { %2496 = vmatmul.mubr.msk.f32.vlgmr.msra.gmra.mxu0 %vm511_vm0, %v1977_v12 }
 0xa3d   : > { %v2058_v29 = vpop.f32.mrf.mxu0 }
 0xa3e   : > { %v2059_v30 = vadd.f32 %v2366_v28, %v2058_v29 }
 0xa3f   : > { %v2497_v31 = vpop.f32.mrf.mxu0 }
 0xa40   : > { %v2062_v32 = vmul.f32 %v2059_v30, %v2059_v30 }
 0xa42   : > { %v2063_v33 = vmul.f32 %v2062_v32, %v2059_v30 }
 0xa44   : > { %v2064_v34 = vmul.f32 0.044715, %v2063_v33 }
 0xa46   : > { %v2065_v35 = vadd.f32 %v2064_v34, %v2059_v30 }
 0xa48   : > { %v2066_v36 = vmul.f32 0.7978846, %v2065_v35 }
 0xa4a   : > { %2618 = vtanh.f32 %v2066_v36 }
 0xa57   : > { %v2619_v8 = vpop.eup %2618 }
 0xa58   : > { %v2068_v37 = vadd.f32 1.0, %v2619_v8 }
 0xa5a   : > { %v2069_v38 = vmul.f32 0.5, %v2068_v37 }
 0xa5c   : > { %v2070_v39 = vmul.f32 %v2069_v38, %v2059_v30 }
 0xa5e   : > { %2531 = vmatmul.mubr.f32.vlgmr.msra.gmra.mxu1 %v2070_v39 }
 0xa5f   : > { %2633 = shalt.err (!%p2630_p3)
}
 0xa60   : > { %s2634_s0 = scalar_lea.hbm %s3142_s26, 128  ;;  %s2638_s16 = scalar_lea.hbm %s3245_s14, 256 }
 0xa61   : > { %p2635_p4 = scmp.ne.s32.totalorder %s3142_s26, %s2634_s0  ;;  %p2639_p9 = scmp.lt.s32.totalorder %s3142_s26, %s3245_s14 }
 0xa62   : > { %p2640_p10 = scmp.lt.s32.totalorder %s2638_s16, %s2634_s0 }
 0xa63   : > { %p2636_p7 = pnand %p2635_p4, %p2873_p5 }
 0xa64   : > { %p2641_p11 = por %p2640_p10, %p2639_p9 }
 0xa65   : > { %p2637_p8 = pneg %p2636_p7 }
 0xa67   : > { %p2642_p12 = pnand %p2641_p11, %p2637_p8 }
 0xa69   : > { %2645 = shalt.err (!%p2642_p12)
}
 0xa6a   : > { %2534 = dma.vmem_to_hbm [thread:$0]  (%p2873_p5), %s2204_s3, 128, %s3142_s26, %s3148_s4  }
 0xa6b   : > { %s2214_s25 = scalar_lea.hbm %s3246_s15, %s3136_s1  ;;  %s2646_s7 = scalar_lea.vmem %s3146_s23, 128 }
 0xa6c   : > { %p2647_p13 = scmp.ne.s32.totalorder %s3146_s23, %s2646_s7  ;;  %s2751_s0 = smov [#allocation6]  }
 0xa6d   : > { %s2650_s2 = sshll.u32 %s2751_s0, 4  ;;  %s2651_s2 = int_to_ptr.vmem [resolvable:$false] %s2650_s2 }
 0xa6e   : > { %p2648_p0 = pnand %p2647_p13, %p2873_p5  ;;  %s2652_s17 = scalar_lea.vmem %s2651_s2, 256 }
 0xa6f   : > { %p2653_p2 = scmp.lt.s32.totalorder %s3146_s23, %s2651_s2  ;;  %p2654_p3 = scmp.lt.s32.totalorder %s2652_s17, %s2646_s7 }
 0xa70   : > { %p2649_p1 = pneg %p2648_p0 }
 0xa71   : > { %p2655_p4 = por %p2654_p3, %p2653_p2 }
 0xa73   : > { %p2656_p7 = pnand %p2655_p4, %p2649_p1 }
 0xa75   : > { %2659 = shalt.err (!%p2656_p7)
}
 0xa76   : > { %s2660_s16 = scalar_lea.hbm %s2214_s25, 128  ;;  %s2664_s22 = scalar_lea.hbm %s3246_s15, 256 }
 0xa77   : > { %p2661_p8 = scmp.ne.s32.totalorder %s2214_s25, %s2660_s16  ;;  %p2665_p11 = scmp.lt.s32.totalorder %s2214_s25, %s3246_s15 }
 0xa78   : > { %p2666_p12 = scmp.lt.s32.totalorder %s2664_s22, %s2660_s16 }
 0xa79   : > { %p2662_p9 = pnand %p2661_p8, %p2873_p5 }
 0xa7a   : > { %p2667_p13 = por %p2666_p12, %p2665_p11 }
 0xa7b   : > { %p2663_p10 = pneg %p2662_p9 }
 0xa7d   : > { %p2668_p0 = pnand %p2667_p13, %p2663_p10 }
 0xa7f   : > { %2671 = shalt.err (!%p2668_p0)
}
 0xa80   : > { %2535 = dma.vmem_to_hbm [thread:$0]  (%p2873_p5), %s3146_s23, 128, %s2214_s25, %s3148_s4   ;;  %v2368_v40 = vld [vmem:[%s3243_s12] ss:$0 sm:$0xff] }
 0xa81   : > { %s489_s2 = scalar_lea.vmem [#allocation2], %s2941_s30  ;;  %s2188_s26 = scalar_lea.hbm %s3244_s13, %s3136_s1 }
 0xa82   : > { %s2190_s17 = sshll.u32 %s489_s2, 4  ;;  %s3271_s22 = sand.u32 1, %s2728_s19   ;;  %s2191_s17 = int_to_ptr.vmem [resolvable:$true] %s2190_s17 }
 0xa83   : > { %s2167_s4 = scalar_lea.sflag [#allocation3], %s3271_s22  ;;  %s2672_s23 = scalar_lea.vmem %s2191_s17, 128 }
 0xa84   : > { %p2673_p1 = scmp.ne.s32.totalorder %s2191_s17, %s2672_s23  ;;  %s2752_s30 = smov [#allocation2]  }
 0xa85   : > { %s2676_s25 = sshll.u32 %s2752_s30, 4  ;;  %s2677_s25 = int_to_ptr.vmem [resolvable:$false] %s2676_s25 }
 0xa86   : > { %p2674_p2 = pnand %p2673_p1, %p2873_p5  ;;  %s2678_s5 = scalar_lea.vmem %s2677_s25, 256 }
 0xa87   : > { %p2679_p4 = scmp.lt.s32.totalorder %s2191_s17, %s2677_s25  ;;  %p2680_p7 = scmp.lt.s32.totalorder %s2678_s5, %s2672_s23 }
 0xa88   : > { %p2675_p3 = pneg %p2674_p2 }
 0xa89   : > { %p2681_p8 = por %p2680_p7, %p2679_p4 }
 0xa8b   : > { %p2682_p9 = pnand %p2681_p8, %p2675_p3 }
 0xb1e   : > { %v2160_v41 = vpop.f32.mrf.mxu1 }
 0xb1f   : > { %v2161_v42 = vadd.f32 %v2368_v40, %v2160_v41 }
 0xb20   : > { %v2532_v43 = vpop.f32.mrf.mxu1 }
 0xb21   : > { %v2164_v44 = vadd.f32 %v2161_v42, %v3038_v51 }
 0xb23   : > { %2165 = vst.msk [vmem:[%s489_s2] sm:$0xff] %vm511_vm0, %v2164_v44 }
 0xb24   : > { %2685 = shalt.err (!%p2682_p9)
}
 0xb25   : > { %s2686_s1 = scalar_lea.hbm %s2188_s26, 128  ;;  %s2690_s0 = scalar_lea.hbm %s3244_s13, 256 }
 0xb26   : > { %p2687_p10 = scmp.ne.s32.totalorder %s2188_s26, %s2686_s1  ;;  %p2691_p13 = scmp.lt.s32.totalorder %s2188_s26, %s3244_s13 }
 0xb27   : > { %p2692_p0 = scmp.lt.s32.totalorder %s2690_s0, %s2686_s1 }
 0xb28   : > { %p2688_p11 = pnand %p2687_p10, %p2873_p5 }
 0xb29   : > { %p2693_p1 = por %p2692_p0, %p2691_p13 }
 0xb2a   : > { %p2689_p12 = pneg %p2688_p11 }
 0xb2c   : > { %p2694_p2 = pnand %p2693_p1, %p2689_p12 }
 0xb2e   : > { %2697 = shalt.err (!%p2694_p2)
}
 0xb2f   : > { %2533 = dma.vmem_to_hbm [thread:$0]  (%p2873_p5), %s2191_s17, 128, %s2188_s26, %s2167_s4  }
 0xb30 PF: > { %p2549_p3 = scmp.ge.s32.totalorder %s2736_s21, 2  ;;  %s2228_s3 = sand.u32 1, %s2724_s18  }
 0xb31   : > { %s2229_s22 = scalar_lea.sflag [#allocation3], %s2228_s3 }
 0xb32   : > { %p2540_p4 = pnand %p2549_p3, %p2877_p6 }
 0xb34   : > { %p2541_p7 = pneg %p2540_p4 }
 0xb36   : > { %2715 = dma.done.wait (%p2541_p7), %s2229_s22, 128  }
 0xb37   : > { %2717 = vsyncadd (%p2541_p7), %s2229_s22, 4294967168  ;;  %s3272_s23 = sadd.s32 4294967294, %s2736_s21  }
 0xb38   : > { %s2237_s30 = sand.u32 1, %s3272_s23  }
 0xb39   : > { %s2238_s25 = scalar_lea.sflag [#allocation5], %s2237_s30 }
 0xb3a   : > { %2719 = dma.done.wait (%p2541_p7), %s2238_s25, 256  }
 0xb3b   : > { %2721 = vsyncadd (%p2541_p7), %s2238_s25, 4294967040  ;;  %p29_p5 = scmp.ge.s32.totalorder %s2858_s24, 4   ;;  %s3273_s18 = smov %s2728_s19 }
 0xb3c   : > { %s3274_s19 = smov %s2732_s20  ;;  %s3275_s20 = smov %s2871_s27 }
 0xb3d   : > { %s3276_s21 = smov %s2858_s24  ;;  %31 = sbr.rel (!%p29_p5) target bundleno = 14 (0xe), region = 139 }
 0xb42   :  { %2252 = vsyncpa [#allocation3], 1 }
 0xb43   :  { %2254 = vsyncpa [#allocation3 + $0x1], 1 }
 0xb44   :  { %2255 = vsyncpa [#allocation5], 1 }
 0xb45   :  { %2257 = vsyncpa [#allocation5 + $0x1], 1 }

</bundles_post_ra>
